<compile_context>
chip_gen: v7x
topology: tpu7x:2x2x1
jax: 0.10.0
libtpu: 0.0.40
codegen_flags: <defaults>
</compile_context>

<pallas_src>
import functools

import jax
import jax.numpy as jnp
from jax.experimental import pallas as pl
from jax.experimental.pallas import tpu as pltpu


def _rca_kernel(
    x1_ref,      # (Bt, S, d_in1)  bf16
    x2_ref,      # (Bt, S, d_in2)  bf16
    wq_ref,      # (d_in1, d_kq)   bf16
    bq_ref,      # (1, d_kq)       f32
    wkv_ref,     # (d_in2, d_kq + d_v)  bf16, fused [Wk | Wv]
    bkv_ref,     # (1, d_kq + d_v) f32
    gamma_ref,   # (1, d_v)        f32
    beta_ref,    # (1, d_v)        f32
    o_ref,       # (Bt, S*d_v) if flat_out else (Bt, S, d_v)
    *,
    d_out_kq: int,
    reverse: bool,
    eps: float,
    flat_out: bool,
):
    bt, s, d_in1 = x1_ref.shape
    d_in2 = x2_ref.shape[-1]
    d_v = gamma_ref.shape[-1]

    # ---- fused projections (MXU, bf16 inputs, f32 accumulation, tall M) ----
    # TODO(synk): verify via pl.lower_as_mlir that these <128-lane reshapes do
    # not materialize VMEM copies at production dims; if they do, switch to a
    # batched 'bsi,io->bso' projection einsum.
    x1 = x1_ref[...].reshape(bt * s, d_in1)
    x2 = x2_ref[...].reshape(bt * s, d_in2)

    q = jnp.dot(x1, wq_ref[...], preferred_element_type=jnp.float32) + bq_ref[0]
    kv = jnp.dot(x2, wkv_ref[...], preferred_element_type=jnp.float32) + bkv_ref[0]
    k = kv[:, :d_out_kq]
    v = kv[:, d_out_kq:]

    q = q.reshape(bt, s, d_out_kq)
    k = k.reshape(bt, s, d_out_kq)
    v = v.reshape(bt, s, d_v)

    # ---- scaled dot-product scores (contract last dims, no K transpose) ----
    scores = jnp.einsum(
        "bqd,bkd->bqk",
        q.astype(jnp.bfloat16), k.astype(jnp.bfloat16),
        preferred_element_type=jnp.float32,
    ) * (1.0 / (d_out_kq ** 0.5))

    # ---- deferred-normalization softmax ----
    m = jnp.max(scores, axis=-1, keepdims=True)
    p = jnp.exp(scores - m)                               # unnormalized, f32
    denom = jnp.sum(p, axis=-1, keepdims=True)            # (Bt, S, 1)
    inv_denom = pl.reciprocal(denom, approx=True)         # EUP slot

    ctx_a = jnp.einsum(                                    # P @ V on the MXU
        "bqk,bkd->bqd",
        p.astype(jnp.bfloat16), v.astype(jnp.bfloat16),
        preferred_element_type=jnp.float32,
    )
    attn_ctx = ctx_a * inv_denom                           # = A @ V

    if reverse:
        # W = (1 - A)/(S-1)  =>  W @ V = (colsum(V) - A @ V) / (S - 1)
        v_colsum = jnp.sum(v, axis=1, keepdims=True)       # (Bt, 1, d_v)
        ctx = (v_colsum - attn_ctx) * (1.0 / (s - 1))
    else:
        ctx = attn_ctx

    # ---- LayerNorm over d_v (f32, PyTorch default eps) + ReLU ----
    mean = jnp.mean(ctx, axis=-1, keepdims=True)
    cen = ctx - mean
    var = jnp.mean(cen * cen, axis=-1, keepdims=True)
    y = cen * jax.lax.rsqrt(var + eps)
    y = y * gamma_ref[0] + beta_ref[0]
    y = jnp.maximum(y, 0.0)

    if flat_out:
        o_ref[...] = y.reshape(bt, s * d_v).astype(o_ref.dtype)   # lane-dense store
    else:
        o_ref[...] = y.astype(o_ref.dtype)


def _tpu_defaults():
    """Generation-aware blocking defaults (conservative for v7x / unknown)."""
    kind = ""
    try:
        kind = jax.devices()[0].device_kind.lower()
    except Exception:
        pass
    if "v5" in kind or "v6" in kind:
        # 128 MiB physical VMEM, single TensorCore: bigger blocks, bigger budget.
        return {"target_rows": 1024, "vmem_limit": 64 * 1024 * 1024}
    # v7x (64 MiB VMEM, 2 TCs) or unknown: stay conservative.
    return {"target_rows": 512, "vmem_limit": 32 * 1024 * 1024}


def _pick_block_b(B, S, d_in1, d_in2, d_kq, d_v, *, target_rows, vmem_budget):
    """Batch elements folded per grid step.

    S^2-aware VMEM estimate (bf16 double-buffered inputs + f32 intermediates),
    prefers block_b that keeps the lane-dense flat output legal (multiple of 8
    or == B) and >= 2 grid steps for megacore sharding on v7x.
    """
    def block_bytes(bt):
        rows = bt * S
        in_b = 2 * 2 * rows * (d_in1 + d_in2)          # bf16 x1/x2, double-buffered
        qkv_b = 4 * rows * (2 * d_kq + d_v)            # f32 q, k, v
        att_b = (4 + 4 + 2) * bt * S * S               # scores(f32) + P(f32) + P(bf16)
        out_b = 2 * 4 * rows * d_v                     # ctx + output buffer
        return in_b + qkv_b + att_b + out_b

    max_rows = max(1, target_rows // max(S, 1))
    cands = [d for d in range(1, B + 1)
             if B % d == 0 and d <= max_rows and block_bytes(d) <= vmem_budget]
    if not cands:
        cands = [1]

    def score(d):
        lane_dense_ok = (d % 8 == 0) or (d == B)
        multi_step = (B // d) >= 2
        return (lane_dense_ok, multi_step, d)

    return max(cands, key=score)


def reverse_cross_attention_pallas(x1, x2, params, *, d_out_kq, reverse=True,
                                   block_b=None, out_dtype=jnp.float32):
    """x1: (B, S, d_in_x1), x2: (B, S, d_in_x2) -> (B, S, d_out_v)."""
    B, S, d_in1 = x1.shape
    B2, S2, d_in2 = x2.shape
    assert B == B2 and S == S2          # module asserts attn_weights is square
    if reverse:
        assert S > 1
    d_kq = params["wq"].shape[1]
    assert d_kq == d_out_kq
    d_v = params["wv"].shape[1]

    defaults = _tpu_defaults()
    if block_b is None:
        block_b = _pick_block_b(
            B, S, d_in1, d_in2, d_kq, d_v,
            target_rows=defaults["target_rows"],
            vmem_budget=(3 * defaults["vmem_limit"]) // 4)
    assert B % block_b == 0
    num_blocks = B // block_b

    # bf16 HBM I/O for the dominant operands (wrapper-side, halves DMA bytes).
    x1_b = x1.astype(jnp.bfloat16)
    x2_b = x2.astype(jnp.bfloat16)
    wq_b = params["wq"].astype(jnp.bfloat16)
    # Fuse K and V projections (same input x2) into one lane-denser matmul.
    wkv_b = jnp.concatenate([params["wk"], params["wv"]], axis=1).astype(jnp.bfloat16)
    bkv = jnp.concatenate([params["bk"], params["bv"]], axis=1)

    # Lane-dense output slab when legal (last dim multiple of 128 & valid block).
    # TODO(synk): when S*d_v % 128 != 0, pad d_v to a 128 multiple instead of
    # falling back to a masked (block_b, S, d_v) store.
    flat_out = ((S * d_v) % 128 == 0) and (block_b == B or block_b % 8 == 0)

    kernel = functools.partial(
        _rca_kernel, d_out_kq=d_out_kq, reverse=reverse, eps=1e-5,
        flat_out=flat_out,
    )

    full = lambda shape: pl.BlockSpec(shape, lambda b: (0,) * len(shape))

    if flat_out:
        out_shape = jax.ShapeDtypeStruct((B, S * d_v), out_dtype)
        out_spec = pl.BlockSpec((block_b, S * d_v), lambda b: (b, 0))
    else:
        out_shape = jax.ShapeDtypeStruct((B, S, d_v), out_dtype)
        out_spec = pl.BlockSpec((block_b, S, d_v), lambda b: (b, 0, 0))

    flops = int(2 * B * S * (d_in1 * d_kq + d_in2 * (d_kq + d_v))
                + 2 * B * S * S * (d_kq + d_v))
    transcendentals = int(B * S * S + 2 * B * S)            # exp + recip + rsqrt
    out_bytes = jnp.dtype(out_dtype).itemsize * B * S * d_v
    bytes_accessed = int(
        2 * (x1_b.size + x2_b.size + wq_b.size + wkv_b.size)     # bf16 inputs
        + 4 * (params["bq"].size + bkv.size
               + params["gamma"].size + params["beta"].size)     # f32 small params
        + out_bytes)

    out = pl.pallas_call(
        kernel,
        out_shape=out_shape,
        grid_spec=pltpu.PrefetchScalarGridSpec(
            num_scalar_prefetch=0,
            grid=(num_blocks,),
            in_specs=[
                pl.BlockSpec((block_b, S, d_in1), lambda b: (b, 0, 0)),
                pl.BlockSpec((block_b, S, d_in2), lambda b: (b, 0, 0)),
                full((d_in1, d_kq)),        # wq  (bf16)
                full((1, d_kq)),            # bq  (f32)
                full((d_in2, d_kq + d_v)),  # wkv (bf16, fused)
                full((1, d_kq + d_v)),      # bkv (f32, fused)
                full((1, d_v)),             # gamma
                full((1, d_v)),             # beta
            ],
            out_specs=out_spec,
        ),
        compiler_params=pltpu.CompilerParams(
            dimension_semantics=("parallel",),
            vmem_limit_bytes=defaults["vmem_limit"],
        ),
        cost_estimate=pl.CostEstimate(
            flops=flops,
            transcendentals=transcendentals,
            bytes_accessed=bytes_accessed,
        ),
    )(x1_b, x2_b, wq_b, params["bq"], wkv_b, bkv,
      params["gamma"], params["beta"])

    if flat_out:
        out = out.reshape(B, S, d_v)        # free (row-major bitcast)
    return out


def init_params(key, d_in_x1, d_in_x2, d_out_kq, d_out_v):
    """Synthetic params with PyTorch nn.Linear-style init; weights feature-major."""
    ks = jax.random.split(key, 6)
    s1 = 1.0 / (d_in_x1 ** 0.5)
    s2 = 1.0 / (d_in_x2 ** 0.5)
    return {
        "wq": jax.random.uniform(ks[0], (d_in_x1, d_out_kq), jnp.float32, -s1, s1),
        "bq": jax.random.uniform(ks[1], (1, d_out_kq), jnp.float32, -s1, s1),
        "wk": jax.random.uniform(ks[2], (d_in_x2, d_out_kq), jnp.float32, -s2, s2),
        "bk": jax.random.uniform(ks[3], (1, d_out_kq), jnp.float32, -s2, s2),
        "wv": jax.random.uniform(ks[4], (d_in_x2, d_out_v), jnp.float32, -s2, s2),
        "bv": jax.random.uniform(ks[5], (1, d_out_v), jnp.float32, -s2, s2),
        "gamma": jnp.ones((1, d_out_v), jnp.float32),   # LayerNorm weight
        "beta": jnp.zeros((1, d_out_v), jnp.float32),   # LayerNorm bias
    }


def reverse_cross_attention_ref(x1, x2, params, *, d_out_kq, reverse=True):
    """Pure-JAX f32 reference mirroring the PyTorch forward."""
    q = x1 @ params["wq"] + params["bq"][0]
    k = x2 @ params["wk"] + params["bk"][0]
    v = x2 @ params["wv"] + params["bv"][0]
    scores = jnp.einsum("bqd,bkd->bqk", q, k)
    w = jax.nn.softmax(scores / (d_out_kq ** 0.5), axis=-1)
    if reverse:
        S = w.shape[1]
        w = (1.0 - w) / (S - 1)
    ctx = jnp.einsum("bqk,bkd->bqd", w, v)
    mean = jnp.mean(ctx, axis=-1, keepdims=True)
    var = jnp.mean((ctx - mean) ** 2, axis=-1, keepdims=True)
    y = (ctx - mean) * jax.lax.rsqrt(var + 1e-5)
    y = y * params["gamma"][0] + params["beta"][0]
    return jnp.maximum(y, 0.0)


if __name__ == "__main__":
    B, S = 2, 8
    d_in_x1, d_in_x2 = 64, 32
    d_out_kq, d_out_v = 16, 32

    key = jax.random.PRNGKey(0)
    k1, k2, kp = jax.random.split(key, 3)
    x1 = jax.random.normal(k1, (B, S, d_in_x1), jnp.float32)
    x2 = jax.random.normal(k2, (B, S, d_in_x2), jnp.float32)
    params = init_params(kp, d_in_x1, d_in_x2, d_out_kq, d_out_v)

    # TODO(synk): the module's debug print statements ('RCA!!' / 'NON RCA') are
    # intentionally omitted from the kernel.
    for reverse in (True, False):
        out = reverse_cross_attention_pallas(
            x1, x2, params, d_out_kq=d_out_kq, reverse=reverse)
        out = jax.block_until_ready(out)
        ref = reverse_cross_attention_ref(
            x1, x2, params, d_out_kq=d_out_kq, reverse=reverse)
        assert out.shape == (B, S, d_out_v), out.shape
        # bf16 MXU / HBM I/O (f32 accumulate) + approx reciprocal -> relaxed tol.
        assert jnp.allclose(out, ref, atol=5e-2, rtol=5e-2), \
            (reverse, float(jnp.max(jnp.abs(out - ref))))

    print("KERNEL_OK")
</pallas_src>

<mosaic_0001>
module attributes {stable_mosaic.version = 11 : i64} {
  func.func @_rca_kernel(%arg0: i32, %arg1: memref<2x8x64xbf16, #tpu.memory_space<vmem>>, %arg2: memref<2x8x32xbf16, #tpu.memory_space<vmem>>, %arg3: memref<64x16xbf16, #tpu.memory_space<vmem>>, %arg4: memref<1x16xf32, #tpu.memory_space<vmem>>, %arg5: memref<32x48xbf16, #tpu.memory_space<vmem>>, %arg6: memref<1x48xf32, #tpu.memory_space<vmem>>, %arg7: memref<1x32xf32, #tpu.memory_space<vmem>>, %arg8: memref<1x32xf32, #tpu.memory_space<vmem>>, %arg9: memref<2x256xf32, #tpu.memory_space<vmem>>) attributes {dimension_semantics = [#tpu.dimension_semantics<parallel>], iteration_bounds = array<i64: 1>, scalar_prefetch = 0 : i64, scratch_operands = 0 : i64, tpu.core_type = #tpu.core_type<tc>, window_params = [{transform_indices = @transform_0, window_bounds = array<i64: 2, 8, 64>}, {transform_indices = @transform_1, window_bounds = array<i64: 2, 8, 32>}, {pipeline_mode = #tpu.pipeline_mode<synchronous>, transform_indices = @transform_2, window_bounds = array<i64: 64, 16>}, {pipeline_mode = #tpu.pipeline_mode<synchronous>, transform_indices = @transform_3, window_bounds = array<i64: 1, 16>}, {pipeline_mode = #tpu.pipeline_mode<synchronous>, transform_indices = @transform_4, window_bounds = array<i64: 32, 48>}, {pipeline_mode = #tpu.pipeline_mode<synchronous>, transform_indices = @transform_5, window_bounds = array<i64: 1, 48>}, {pipeline_mode = #tpu.pipeline_mode<synchronous>, transform_indices = @transform_6, window_bounds = array<i64: 1, 32>}, {pipeline_mode = #tpu.pipeline_mode<synchronous>, transform_indices = @transform_7, window_bounds = array<i64: 1, 32>}, {transform_indices = @transform_8, window_bounds = array<i64: 2, 256>}]} {
    %c0 = arith.constant 0 : index
    %c0_0 = arith.constant 0 : index
    %c0_1 = arith.constant 0 : index
    %0 = vector.load %arg1[%c0, %c0_0, %c0_1] : memref<2x8x64xbf16, #tpu.memory_space<vmem>>, vector<2x8x64xbf16>
    %1 = vector.shape_cast %0 : vector<2x8x64xbf16> to vector<16x64xbf16>
    %c0_2 = arith.constant 0 : index
    %c0_3 = arith.constant 0 : index
    %c0_4 = arith.constant 0 : index
    %2 = vector.load %arg2[%c0_2, %c0_3, %c0_4] : memref<2x8x32xbf16, #tpu.memory_space<vmem>>, vector<2x8x32xbf16>
    %3 = vector.shape_cast %2 : vector<2x8x32xbf16> to vector<16x32xbf16>
    %c0_5 = arith.constant 0 : index
    %c0_6 = arith.constant 0 : index
    %4 = vector.load %arg3[%c0_5, %c0_6] : memref<64x16xbf16, #tpu.memory_space<vmem>>, vector<64x16xbf16>
    %cst = arith.constant dense<0.000000e+00> : vector<16x16xf32>
    %5 = tpu.matmul %1, %4, %cst {dimension_numbers = #tpu.dot_dimension_numbers<[1], [0], [0], [1], [0, 0, 1, 1], [], []>} : vector<16x64xbf16>, vector<64x16xbf16>, vector<16x16xf32> -> vector<16x16xf32>
    %c0_7 = arith.constant 0 : index
    %c0_8 = arith.constant 0 : index
    %6 = vector.load %arg4[%c0_7, %c0_8] : memref<1x16xf32, #tpu.memory_space<vmem>>, vector<1x16xf32>
    %7 = vector.shape_cast %6 : vector<1x16xf32> to vector<16xf32>
    %8 = vector.shape_cast %7 : vector<16xf32> to vector<1x16xf32>
    %9 = vector.broadcast %8 : vector<1x16xf32> to vector<16x16xf32>
    %10 = arith.addf %5, %9 : vector<16x16xf32>
    %c0_9 = arith.constant 0 : index
    %c0_10 = arith.constant 0 : index
    %11 = vector.load %arg5[%c0_9, %c0_10] : memref<32x48xbf16, #tpu.memory_space<vmem>>, vector<32x48xbf16>
    %cst_11 = arith.constant dense<0.000000e+00> : vector<16x48xf32>
    %12 = tpu.matmul %3, %11, %cst_11 {dimension_numbers = #tpu.dot_dimension_numbers<[1], [0], [0], [1], [0, 0, 1, 1], [], []>} : vector<16x32xbf16>, vector<32x48xbf16>, vector<16x48xf32> -> vector<16x48xf32>
    %c0_12 = arith.constant 0 : index
    %c0_13 = arith.constant 0 : index
    %13 = vector.load %arg6[%c0_12, %c0_13] : memref<1x48xf32, #tpu.memory_space<vmem>>, vector<1x48xf32>
    %14 = vector.shape_cast %13 : vector<1x48xf32> to vector<48xf32>
    %15 = vector.shape_cast %14 : vector<48xf32> to vector<1x48xf32>
    %16 = vector.broadcast %15 : vector<1x48xf32> to vector<16x48xf32>
    %17 = arith.addf %12, %16 : vector<16x48xf32>
    %18 = vector.extract_strided_slice %17 {offsets = [0, 0], sizes = [16, 16], strides = [1, 1]} : vector<16x48xf32> to vector<16x16xf32>
    %19 = vector.extract_strided_slice %17 {offsets = [0, 16], sizes = [16, 32], strides = [1, 1]} : vector<16x48xf32> to vector<16x32xf32>
    %20 = vector.shape_cast %10 : vector<16x16xf32> to vector<2x8x16xf32>
    %21 = vector.shape_cast %18 : vector<16x16xf32> to vector<2x8x16xf32>
    %22 = vector.shape_cast %19 : vector<16x32xf32> to vector<2x8x32xf32>
    %23 = arith.truncf %20 : vector<2x8x16xf32> to vector<2x8x16xbf16>
    %24 = arith.truncf %21 : vector<2x8x16xf32> to vector<2x8x16xbf16>
    "tpu.trace_start"() <{level = 10 : i32, message = "bqd,bkd->bqk"}> : () -> ()
    %cst_14 = arith.constant dense<0.000000e+00> : vector<2x8x8xf32>
    %25 = tpu.matmul %23, %24, %cst_14 {dimension_numbers = #tpu.dot_dimension_numbers<[2], [2], [1], [1], [0, 0, 0, 1, 1, 1], [0], [0]>} : vector<2x8x16xbf16>, vector<2x8x16xbf16>, vector<2x8x8xf32> -> vector<2x8x8xf32>
    "tpu.trace_stop"() : () -> ()
    %cst_15 = arith.constant 2.500000e-01 : f32
    %26 = vector.broadcast %cst_15 : f32 to vector<2x8x8xf32>
    %27 = arith.mulf %25, %26 : vector<2x8x8xf32>
    %cst_16 = arith.constant dense<0xFF800000> : vector<2x8xf32>
    %28 = vector.multi_reduction <maximumf>, %27, %cst_16 [2] : vector<2x8x8xf32> to vector<2x8xf32>
    %29 = vector.shape_cast %28 : vector<2x8xf32> to vector<2x8x1xf32>
    %30 = vector.broadcast %29 : vector<2x8x1xf32> to vector<2x8x8xf32>
    %31 = arith.subf %27, %30 : vector<2x8x8xf32>
    %32 = math.exp %31 : vector<2x8x8xf32>
    %cst_17 = arith.constant dense<0.000000e+00> : vector<2x8xf32>
    %33 = vector.multi_reduction <add>, %32, %cst_17 [2] : vector<2x8x8xf32> to vector<2x8xf32>
    %34 = vector.shape_cast %33 : vector<2x8xf32> to vector<2x8x1xf32>
    %35 = tpu.reciprocal %34 {approx = true} : vector<2x8x1xf32> -> vector<2x8x1xf32>
    %36 = arith.truncf %32 : vector<2x8x8xf32> to vector<2x8x8xbf16>
    %37 = arith.truncf %22 : vector<2x8x32xf32> to vector<2x8x32xbf16>
    "tpu.trace_start"() <{level = 10 : i32, message = "bqk,bkd->bqd"}> : () -> ()
    %cst_18 = arith.constant dense<0.000000e+00> : vector<2x8x32xf32>
    %38 = tpu.matmul %36, %37, %cst_18 {dimension_numbers = #tpu.dot_dimension_numbers<[2], [1], [1], [2], [0, 0, 0, 1, 1, 2], [0], [0]>} : vector<2x8x8xbf16>, vector<2x8x32xbf16>, vector<2x8x32xf32> -> vector<2x8x32xf32>
    "tpu.trace_stop"() : () -> ()
    %39 = vector.broadcast %35 : vector<2x8x1xf32> to vector<2x8x32xf32>
    %40 = arith.mulf %38, %39 : vector<2x8x32xf32>
    %cst_19 = arith.constant dense<0.000000e+00> : vector<2x32xf32>
    %41 = vector.multi_reduction <add>, %22, %cst_19 [1] : vector<2x8x32xf32> to vector<2x32xf32>
    %42 = vector.shape_cast %41 : vector<2x32xf32> to vector<2x1x32xf32>
    %43 = vector.broadcast %42 : vector<2x1x32xf32> to vector<2x8x32xf32>
    %44 = arith.subf %43, %40 : vector<2x8x32xf32>
    %cst_20 = arith.constant 0.142857149 : f32
    %45 = vector.broadcast %cst_20 : f32 to vector<2x8x32xf32>
    %46 = arith.mulf %44, %45 : vector<2x8x32xf32>
    %cst_21 = arith.constant dense<0.000000e+00> : vector<2x8xf32>
    %47 = vector.multi_reduction <add>, %46, %cst_21 [2] : vector<2x8x32xf32> to vector<2x8xf32>
    %48 = vector.shape_cast %47 : vector<2x8xf32> to vector<2x8x1xf32>
    %cst_22 = arith.constant 3.200000e+01 : f32
    %49 = vector.broadcast %cst_22 : f32 to vector<2x8x1xf32>
    %50 = arith.divf %48, %49 : vector<2x8x1xf32>
    %51 = vector.broadcast %50 : vector<2x8x1xf32> to vector<2x8x32xf32>
    %52 = arith.subf %46, %51 : vector<2x8x32xf32>
    %53 = arith.mulf %52, %52 : vector<2x8x32xf32>
    %cst_23 = arith.constant dense<0.000000e+00> : vector<2x8xf32>
    %54 = vector.multi_reduction <add>, %53, %cst_23 [2] : vector<2x8x32xf32> to vector<2x8xf32>
    %55 = vector.shape_cast %54 : vector<2x8xf32> to vector<2x8x1xf32>
    %cst_24 = arith.constant 3.200000e+01 : f32
    %56 = vector.broadcast %cst_24 : f32 to vector<2x8x1xf32>
    %57 = arith.divf %55, %56 : vector<2x8x1xf32>
    %cst_25 = arith.constant 9.99999974E-6 : f32
    %58 = vector.broadcast %cst_25 : f32 to vector<2x8x1xf32>
    %59 = arith.addf %57, %58 : vector<2x8x1xf32>
    %60 = math.rsqrt %59 : vector<2x8x1xf32>
    %61 = vector.broadcast %60 : vector<2x8x1xf32> to vector<2x8x32xf32>
    %62 = arith.mulf %52, %61 : vector<2x8x32xf32>
    %c0_26 = arith.constant 0 : index
    %c0_27 = arith.constant 0 : index
    %63 = vector.load %arg7[%c0_26, %c0_27] : memref<1x32xf32, #tpu.memory_space<vmem>>, vector<1x32xf32>
    %64 = vector.shape_cast %63 : vector<1x32xf32> to vector<32xf32>
    %65 = vector.shape_cast %64 : vector<32xf32> to vector<1x1x32xf32>
    %66 = vector.broadcast %65 : vector<1x1x32xf32> to vector<2x8x32xf32>
    %67 = arith.mulf %62, %66 : vector<2x8x32xf32>
    %c0_28 = arith.constant 0 : index
    %c0_29 = arith.constant 0 : index
    %68 = vector.load %arg8[%c0_28, %c0_29] : memref<1x32xf32, #tpu.memory_space<vmem>>, vector<1x32xf32>
    %69 = vector.shape_cast %68 : vector<1x32xf32> to vector<32xf32>
    %70 = vector.shape_cast %69 : vector<32xf32> to vector<1x1x32xf32>
    %71 = vector.broadcast %70 : vector<1x1x32xf32> to vector<2x8x32xf32>
    %72 = arith.addf %67, %71 : vector<2x8x32xf32>
    %cst_30 = arith.constant 0.000000e+00 : f32
    %73 = vector.broadcast %cst_30 : f32 to vector<2x8x32xf32>
    %74 = arith.maximumf %72, %73 : vector<2x8x32xf32>
    %75 = vector.shape_cast %74 : vector<2x8x32xf32> to vector<2x256xf32>
    %c0_31 = arith.constant 0 : index
    %c0_32 = arith.constant 0 : index
    %76 = vector.load %arg9[%c0_31, %c0_32] : memref<2x256xf32, #tpu.memory_space<vmem>>, vector<2x256xf32>
    tpu.vector_store %arg9[%c0_31, %c0_32], %75 {strides = array<i32>} : memref<2x256xf32, #tpu.memory_space<vmem>>, vector<2x256xf32>,
    return
  }
  func.func @transform_0(%arg0: i32) -> (i32, i32, i32) {
    %c0_i32 = arith.constant 0 : i32
    %c0_i32_0 = arith.constant 0 : i32
    %c0_i32_1 = arith.constant 0 : i32
    return %arg0, %c0_i32, %c0_i32_0 : i32, i32, i32
  }
  func.func @transform_1(%arg0: i32) -> (i32, i32, i32) {
    %c0_i32 = arith.constant 0 : i32
    %c0_i32_0 = arith.constant 0 : i32
    %c0_i32_1 = arith.constant 0 : i32
    return %arg0, %c0_i32, %c0_i32_0 : i32, i32, i32
  }
  func.func @transform_2(%arg0: i32) -> (i32, i32) {
    %c0_i32 = arith.constant 0 : i32
    %c0_i32_0 = arith.constant 0 : i32
    %c0_i32_1 = arith.constant 0 : i32
    return %c0_i32, %c0_i32_0 : i32, i32
  }
  func.func @transform_3(%arg0: i32) -> (i32, i32) {
    %c0_i32 = arith.constant 0 : i32
    %c0_i32_0 = arith.constant 0 : i32
    %c0_i32_1 = arith.constant 0 : i32
    return %c0_i32, %c0_i32_0 : i32, i32
  }
  func.func @transform_4(%arg0: i32) -> (i32, i32) {
    %c0_i32 = arith.constant 0 : i32
    %c0_i32_0 = arith.constant 0 : i32
    %c0_i32_1 = arith.constant 0 : i32
    return %c0_i32, %c0_i32_0 : i32, i32
  }
  func.func @transform_5(%arg0: i32) -> (i32, i32) {
    %c0_i32 = arith.constant 0 : i32
    %c0_i32_0 = arith.constant 0 : i32
    %c0_i32_1 = arith.constant 0 : i32
    return %c0_i32, %c0_i32_0 : i32, i32
  }
  func.func @transform_6(%arg0: i32) -> (i32, i32) {
    %c0_i32 = arith.constant 0 : i32
    %c0_i32_0 = arith.constant 0 : i32
    %c0_i32_1 = arith.constant 0 : i32
    return %c0_i32, %c0_i32_0 : i32, i32
  }
  func.func @transform_7(%arg0: i32) -> (i32, i32) {
    %c0_i32 = arith.constant 0 : i32
    %c0_i32_0 = arith.constant 0 : i32
    %c0_i32_1 = arith.constant 0 : i32
    return %c0_i32, %c0_i32_0 : i32, i32
  }
  func.func @transform_8(%arg0: i32) -> (i32, i32) {
    %c0_i32 = arith.constant 0 : i32
    %c0_i32_0 = arith.constant 0 : i32
    return %arg0, %c0_i32 : i32, i32
  }
}

</mosaic_0001>

<bundles_post_ra>
// kernel: tpu_custom_call.1
= control target key start
LH: loop header
LB: loop body
LE: loop exit
PB: predicated region body
PF: predicated region fallthrough
CT: control target
= control target key end

     0   :  { %v778_v1 = vmov 0.0   ;;  %vm779_vm0 = vmmov 0   ;;  %vm152_vm1 = vcmask 261120   ;;  %s951_s0 = inlined_call_operand.vmem [shape: bf16[2,8,64], index: 0, kind: input, shape index: {}]   ;;  %s952_s1 = inlined_call_operand.vmem [shape: bf16[2,8,32], index: 1, kind: input, shape index: {}]   ;;  %s953_s2 = inlined_call_operand.vmem [shape: bf16[64,16], index: 2, kind: input, shape index: {}]   ;;  %s954_s3 = inlined_call_operand.vmem [shape: f32[1,16], index: 3, kind: input, shape index: {}]   ;;  %s955_s4 = inlined_call_operand.vmem [shape: bf16[32,48], index: 4, kind: input, shape index: {}]   ;;  %s956_s5 = inlined_call_operand.vmem [shape: f32[1,48], index: 5, kind: input, shape index: {}]   ;;  %s957_s6 = inlined_call_operand.vmem [shape: f32[1,32], index: 6, kind: input, shape index: {}]   ;;  %s958_s7 = inlined_call_operand.vmem [shape: f32[1,32], index: 7, kind: input, shape index: {}]   ;;  %s959_s8 = inlined_call_operand.hbm [shape: f32[2,256], index: 8, kind: output, shape index: {}]  }
   0x1   :  { %v734_v0 = vld [vmem:[%s953_s2] sm:$0xff]   ;;  %680 = vmatprep.subr.bf16.mxu0 %v778_v1  ;;  %692 = vmatprep.subr.bf16.mxu1 %v778_v1  ;;  %v736_v3 = vld [vmem:[%s953_s2 + $0x8] sm:$0xff]   ;;  %v739_v6 = vld [vmem:[%s953_s2 + $0x10] sm:$0xff]  }
   0x2   :  { %v735_v2 = vld [vmem:[%s955_s4] sm:$0xff]   ;;  %681 = vmatpush3.bf16.msra.mxu0 %v734_v0  ;;  %696 = vmatprep.mubr.msk.bf16.mxu1 %vm779_vm0, %v778_v1  ;;  %v737_v4 = vld [vmem:[%s955_s4 + $0x8] sm:$0xff]  }
   0x3   :  { %693 = vmatpush3.bf16.msra.mxu1 %v735_v2  ;;  %682 = vmatprep.subr.bf16.mxu0 %v778_v1  ;;  %v738_v5 = vld [vmem:[%s952_s1] sm:$0xff]  }
   0x4   :  { %694 = vmatprep.subr.bf16.mxu1 %v778_v1  ;;  %688 = vmatprep.mubr.msk.bf16.mxu0 %vm779_vm0, %v778_v1 }
   0x6   :  { %683 = vmatpush3.bf16.msra.mxu0 %v736_v3 }
   0x7   :  { %695 = vmatpush3.bf16.msra.mxu1 %v737_v4  ;;  %684 = vmatprep.subr.bf16.mxu0 %v778_v1 }
   0x8   :  { %700 = vmatprep.subr.bf16.mxu1 %v778_v1 }
   0x9   :  { %13 = vsyncpa [#allocation3], 0  ;;  %v740_v7 = vld [vmem:[%s953_s2 + $0x18] sm:$0xff]   ;;  %v741_v8 = vld [vmem:[%s951_s0] sm:$0xff]   ;;  %vm79_vm2 = vcmask 523264   ;;  %vm201_vm3 = vcmask 130048  }
   0xa   :  { %697 = vmatmul.mubr.msk.bf16.vlgmr.msra.gmra.mrb[0].mxu1 %vm152_vm1, %v738_v5  ;;  %685 = vmatpush3.bf16.msra.mxu0 %v739_v6  ;;  %v652_v9 = vld [vmem:[%s956_s5] ss:$0 sm:$0xff]  ;;  %s780_s0 = smov 112   ;;  %vm325_vm4 = vcmask 1043456   ;;  %vm296_vm5 = vcmask 64512   ;;  %vm420_vm6 = vcmask 392320  }
   0xb   :  { %686 = vmatprep.subr.bf16.mxu0 %v778_v1  ;;  %702 = vmatprep.mubr.msk.bf16.mxu1 %vm779_vm0, %v778_v1  ;;  %v645_v19 = vld [vmem:[%s954_s3] ss:$0 sm:$0xff]  ;;  %s781_s3 = smov 16   ;;  %s786_s25 = smov 96   ;;  %vm614_vm7 = vcmask 785408  }
   0xc   :  { %s787_s26 = smov [#allocation2]  }
   0xd   :  { %s637_s27 = sshll.u32 %s787_s26, 4  ;;  %s638_s27 = int_to_ptr.vmem [resolvable:$true] %s637_s27 }
   0xe   :  { %687 = vmatpush3.bf16.msra.mxu0 %v740_v7  ;;  %s754_s28 = scalar_lea.vmem %s638_s27, 64  ;;  %p759_p1 = scmp.lt.s32.totalorder %s638_s27, %s638_s27 }
   0xf   :  { %706 = vmatprep.subr.bf16.mxu0 %v778_v1  ;;  %p755_p0 = scmp.ne.s32.totalorder %s638_s27, %s754_s28  ;;  %p760_p2 = scmp.lt.s32.totalorder %s754_s28, %s754_s28 }
  0x11   :  { %689 = vmatmul.mubr.msk.bf16.vlgmr.msra.gmra.mrb[0].mxu0 %vm79_vm2, %v741_v8  ;;  %p761_p3 = por %p760_p2, %p759_p1 }
  0x12   :  { %708 = vmatprep.mubr.msk.bf16.mxu0 %vm779_vm0, %v778_v1 }
  0x13   :  { %p762_p4 = pnand %p761_p3, %p755_p0 }
  0xdd   :  { %v190_v10 = vpop.f32.mrb[0].mxu1 }
  0xde   :  { %v878_v11 = vadd.f32 %v652_v9, %v190_v10  ;;  %v698_v12 = vpop.f32.mrb[1].mxu1 }
  0xdf   :  { %v193_v13 = vpop.f32.mrb[2].mxu1 }
  0xe0   :  { %v880_v14 = vadd.f32 %v652_v9, %v193_v13  ;;  %v699_v15 = vpop.f32.mrb[3].mxu1  ;;  %v199_v16 = vpack.c.bf16 %v878_v11, %v878_v11  ;;  %v421_v8 = vsel %vm420_vm6, %v878_v11, 0.0 }
  0xe1   :  { %v422_v9 = vrot.slane %v421_v8, 4 }
  0xe2   :  { %v200_v17 = vpack.c.bf16 %v880_v14, %v880_v14  ;;  %320 = vrot.lane.b32.xlu1 %v199_v16, %s780_s0  ;;  %v206_v18 = vsel %vm201_vm3, %v199_v16, 0  ;;  %v428_v10 = vsel %vm420_vm6, %v880_v14, 0.0 }
  0xe3   :  { %701 = vmatpush3.bf16.xpose.msra.mxu1 %v206_v18  ;;  %v423_v12 = vadd.f32 %v422_v9, %v421_v8  ;;  %v429_v13 = vrot.slane %v428_v10, 4 }
  0xe4   :  { %v117_v20 = vpop.f32.mrb[0].mxu0  ;;  %v252_v21 = vsel %vm201_vm3, %v200_v17, 0  ;;  %712 = vmatprep.subr.bf16.mxu1 %v778_v1 }
  0xe5   :  { %v118_v22 = vadd.f32 %v645_v19, %v117_v20  ;;  %707 = vmatpush3.bf16.xpose.msra.mxu0 %v252_v21  ;;  %v690_v23 = vpop.f32.mrb[1].mxu0  ;;  %v424_v15 = vrot.slane %v423_v12, 2  ;;  %v430_v16 = vadd.f32 %v429_v13, %v428_v10 }
  0xe6   :  { %370 = vrot.lane.b32.xlu1 %v200_v17, %s780_s0  ;;  %v120_v24 = vpop.f32.mrb[2].mxu0  ;;  %718 = vmatprep.subr.bf16.mxu0 %v778_v1 }
  0xe7   :  { %v197_v25 = vpack.c.bf16 %v118_v22, %v118_v22  ;;  %v121_v26 = vadd.f32 %v645_v19, %v120_v24  ;;  %v691_v27 = vpop.f32.mrb[3].mxu0  ;;  %v431_v17 = vrot.slane %v430_v16, 2  ;;  %v425_v18 = vadd.f32 %v424_v15, %v423_v12 }
  0xe9   :  { %v198_v28 = vpack.c.bf16 %v121_v26, %v121_v26  ;;  %v426_v19 = vrot.slane %v425_v18, 1  ;;  %v432_v20 = vadd.f32 %v431_v17, %v430_v16 }
  0xea   :  { %703 = vmatmul.mubr.msk.bf16.vlgmr.msra.gmra.mrb[4].mxu1 %vm201_vm3, %v197_v25 }
  0xeb   :  { %714 = vmatprep.mubr.msk.bf16.mxu1 %vm779_vm0, %v778_v1  ;;  %v427_v21 = vadd.f32 %v426_v19, %v425_v18  ;;  %v433_v22 = vrot.slane %v432_v20, 1 }
  0xec   :  { %709 = vmatmul.mubr.msk.bf16.vlgmr.msra.gmra.mrb[4].mxu0 %vm201_vm3, %v198_v28 }
  0xed   :  { %720 = vmatprep.mubr.msk.bf16.mxu0 %vm779_vm0, %v778_v1  ;;  %v434_v26 = vadd.f32 %v433_v22, %v432_v20 }
 0x154   :  { %v321_v29 = vpop.permute.xlu1 %320 }
 0x155   :  { %v327_v30 = vsel %vm325_vm4, %v321_v29, 0 }
 0x156   :  { %713 = vmatpush3.bf16.msra.mxu1 %v327_v30 }
 0x158   :  { %v371_v31 = vpop.permute.xlu1 %370 }
 0x159   :  { %v376_v32 = vsel %vm325_vm4, %v371_v31, 0 }
 0x15a   :  { %719 = vmatpush3.bf16.msra.mxu0 %v376_v32 }
 0x1bd   :  { %v242_v33 = vpop.f32.mrb[4].mxu1 }
 0x1be   :  { %v294_v34 = vmul.f32 0.25, %v242_v33  ;;  %v704_v35 = vpop.f32.mrb[5].mxu1 }
 0x1bf   :  { %v245_v36 = vpop.f32.mrb[6].mxu1  ;;  %v288_v37 = vpop.f32.mrb[4].mxu0 }
 0x1c0   :  { %v295_v38 = vmul.f32 0.25, %v288_v37  ;;  %v705_v39 = vpop.f32.mrb[7].mxu1  ;;  %v710_v40 = vpop.f32.mrb[5].mxu0  ;;  %v297_v41 = vsel %vm296_vm5, %v294_v34, -inf }
 0x1c1   :  { %298 = vmax.xlane.f32.xlu0 %v297_v41  ;;  %v291_v42 = vpop.f32.mrb[6].mxu0 }
 0x1c2   :  { %v711_v43 = vpop.f32.mrb[7].mxu0  ;;  %v300_v44 = vsel %vm296_vm5, %v295_v38, -inf }
 0x1c5   :  { %301 = vmax.xlane.f32.xlu0 %v300_v44  ;;  %v661_v44 = vld [vmem:[%s957_s6] ss:$0 sm:$0xff]  ;;  %s784_s6 = smov 64  }
 0x24e   :  { %v299_v45 = vpop.xlane.xlu0 %298 }
 0x24f   :  { %v303_v46 = vsub.f32 %v294_v34, %v299_v45  ;;  %v662_v45 = vld [vmem:[%s958_s7] ss:$0 sm:$0xff]  ;;  %s785_s7 = smov 32  }
 0x251   :  { %v305_v47 = vmul.f32 1.442695, %v303_v46 }
 0x252   :  { %v302_v48 = vpop.xlane.xlu0 %301 }
 0x253   :  { %742 = vpow2.f32 %v305_v47  ;;  %v304_v49 = vsub.f32 %v295_v38, %v302_v48 }
 0x255   :  { %v307_v50 = vmul.f32 1.442695, %v304_v49 }
 0x257   :  { %744 = vpow2.f32 %v307_v50 }
 0x25d   :  { %v743_v51 = vpop.eup %742 }
 0x25e   :  { %v309_v52 = vsel %vm296_vm5, %v743_v51, 0.0  ;;  %v317_v53 = vpack.c.bf16 %v743_v51, %v743_v51 }
 0x25f   :  { %310 = vadd.xlane.f32.xlu0 %v309_v52 }
 0x260   :  { %715 = vmatmul.mubr.msk.bf16.vlgmr.msra.gmra.mrb[8].mxu1 %vm296_vm5, %v317_v53 }
 0x261   :  { %v745_v54 = vpop.eup %744 }
 0x262   :  { %v312_v55 = vsel %vm296_vm5, %v745_v54, 0.0  ;;  %v318_v56 = vpack.c.bf16 %v745_v54, %v745_v54 }
 0x263   :  { %313 = vadd.xlane.f32.xlu1 %v312_v55 }
 0x264   :  { %721 = vmatmul.mubr.msk.bf16.vlgmr.msra.gmra.mrb[8].mxu0 %vm296_vm5, %v318_v56 }
 0x2ec   :  { %v311_v57 = vpop.xlane.xlu0 %310 }
 0x2ed   :  { %746 = vrcp.f32 %v311_v57 }
 0x2f0   :  { %v314_v58 = vpop.xlane.xlu1 %313 }
 0x2f1   :  { %748 = vrcp.f32 %v314_v58 }
 0x2f7   :  { %v747_v59 = vpop.eup %746 }
 0x2fb   :  { %v749_v2 = vpop.eup %748 }
 0x333   :  { %v363_v60 = vpop.f32.mrb[8].mxu1 }
 0x334   :  { %v418_v61 = vmul.f32 %v747_v59, %v363_v60  ;;  %v716_v62 = vpop.f32.mrb[9].mxu1 }
 0x335   :  { %v366_v63 = vpop.f32.mrb[10].mxu1 }
 0x336   :  { %v717_v0 = vpop.f32.mrb[11].mxu1  ;;  %437 = vrot.lane.b32.xlu0 %v418_v61, %s781_s3 }
 0x337   :  { %v412_v3 = vpop.f32.mrb[8].mxu0  ;;  %v782_v0 = vmov 1983009808  }
 0x338   :  { %v419_v4 = vmul.f32 %v749_v2, %v412_v3  ;;  %v722_v5 = vpop.f32.mrb[9].mxu0  ;;  %v524_v2 = vunpack.c.l.s4 %v782_v0  ;;  %v526_v3 = vlaneseq }
 0x339   :  { %v415_v6 = vpop.f32.mrb[10].mxu0 }
 0x33a   :  { %439 = vrot.lane.b32.xlu0 %v419_v4, %s781_s3  ;;  %v723_v7 = vpop.f32.mrb[11].mxu0  ;;  %v525_v4 = vunpack.c.0.s8 %v524_v2  ;;  %v527_v5 = vshrl.u32 %v526_v3, 7  ;;  %v783_v6 = vmov 1934713408  }
 0x33b   :  { %v555_v7 = vunpack.c.l.s4 %v783_v6 }
 0x33c   :  { %v528_v9 = vsub.s32 %v525_v4, %v527_v5 }
 0x33d   :  { %v556_v10 = vunpack.c.0.s8 %v555_v7 }
 0x33f   :  { %v559_v16 = vsub.s32 %v556_v10, %v527_v5 }
 0x3a8   :  { %v438_v23 = vpop.permute.xlu0 %437 }
 0x3a9   :  { %v443_v24 = vsub.f32 %v427_v21, %v438_v23 }
 0x3ab   :  { %v445_v25 = vmul.f32 0.14285715, %v443_v24 }
 0x3ac   :  { %v440_v27 = vpop.permute.xlu0 %439 }
 0x3ad   :  { %v444_v28 = vsub.f32 %v434_v26, %v440_v27  ;;  %449 = vrot.lane.b32.xlu0 %v445_v25, %s780_s0 }
 0x3af   :  { %v446_v11 = vmul.f32 0.14285715, %v444_v28 }
 0x3b1   :  { %451 = vrot.lane.b32.xlu0 %v446_v11, %s780_s0 }
 0x41f   :  { %v450_v14 = vpop.permute.xlu0 %449 }
 0x420   :  { %v455_v29 = vsel %vm152_vm1, %v450_v14, 0.0 }
 0x421   :  { %456 = vadd.xlane.f32.xlu1 %v455_v29 }
 0x423   :  { %v452_v30 = vpop.permute.xlu0 %451 }
 0x424   :  { %v458_v31 = vsel %vm152_vm1, %v452_v30, 0.0 }
 0x425   :  { %459 = vadd.xlane.f32.xlu0 %v458_v31 }
 0x4ae   :  { %v457_v32 = vpop.xlane.xlu1 %456 }
 0x4af   :  { %v462_v33 = vmul.f32 0.03125, %v457_v32 }
 0x4b1   :  { %v464_v34 = vsub.f32 %v445_v25, %v462_v33 }
 0x4b2   :  { %v460_v35 = vpop.xlane.xlu0 %459 }
 0x4b3   :  { %v463_v36 = vmul.f32 0.03125, %v460_v35  ;;  %v466_v37 = vmul.f32 %v464_v34, %v464_v34 }
 0x4b5   :  { %v465_v38 = vsub.f32 %v446_v11, %v463_v36  ;;  %470 = vrot.lane.b32.xlu1 %v466_v37, %s780_s0 }
 0x4b7   :  { %v467_v39 = vmul.f32 %v465_v38, %v465_v38 }
 0x4b9   :  { %472 = vrot.lane.b32.xlu1 %v467_v39, %s780_s0 }
 0x527   :  { %v471_v40 = vpop.permute.xlu1 %470 }
 0x528   :  { %v476_v41 = vsel %vm152_vm1, %v471_v40, 0.0 }
 0x529   :  { %477 = vadd.xlane.f32.xlu1 %v476_v41 }
 0x52b   :  { %v473_v42 = vpop.permute.xlu1 %472 }
 0x52c   :  { %v479_v43 = vsel %vm152_vm1, %v473_v42, 0.0 }
 0x52d   :  { %480 = vadd.xlane.f32.xlu0 %v479_v43 }
 0x543   :  { %496 = vrot.lane.b32.xlu0 %v661_v44, %s781_s3 }
 0x547   :  { %507 = vrot.lane.b32.xlu0 %v662_v45, %s781_s3 }
 0x5b6   :  { %v478_v46 = vpop.xlane.xlu1 %477 }
 0x5b7   :  { %v482_v47 = vmul.f32 0.03125, %v478_v46 }
 0x5b9   :  { %v484_v48 = vadd.f32 1e-05, %v482_v47 }
 0x5ba   :  { %v481_v49 = vpop.xlane.xlu0 %480 }
 0x5bb   :  { %750 = vrsqrt.f32 %v484_v48  ;;  %v483_v50 = vmul.f32 0.03125, %v481_v49 }
 0x5bd   :  { %v485_v51 = vadd.f32 1e-05, %v483_v50 }
 0x5be   :  { %v497_v52 = vpop.permute.xlu0 %496 }
 0x5bf   :  { %752 = vrsqrt.f32 %v485_v51 }
 0x5c2   :  { %v508_v55 = vpop.permute.xlu0 %507 }
 0x5c5   :  { %v751_v53 = vpop.eup %750 }
 0x5c6   :  { %v488_v54 = vmul.f32 %v751_v53, %v464_v34 }
 0x5c8   :  { %v499_v56 = vmul.f32 %v497_v52, %v488_v54 }
 0x5c9   :  { %v753_v57 = vpop.eup %752 }
 0x5ca   :  { %v489_v58 = vmul.f32 %v753_v57, %v465_v38  ;;  %v510_v59 = vadd.f32 %v508_v55, %v499_v56 }
 0x5cc   :  { %v500_v60 = vmul.f32 %v497_v52, %v489_v58  ;;  %v512_v61 = vmax.f32 %v510_v59, 0.0 }
 0x5ce   :  { %v511_v62 = vadd.f32 %v508_v55, %v500_v60  ;;  %516 = vrot.lane.b32.xlu1 %v512_v61, %s780_s0 }
 0x5d0   :  { %v513_v63 = vmax.f32 %v511_v62, 0.0 }
 0x5d2   :  { %518 = vrot.lane.b32.xlu0 %v513_v63, %s780_s0 }
 0x640   :  { %v517_v8 = vpop.permute.xlu1 %516 }
 0x641   :  { %v522_v12 = vcombine.high %v517_v8, %v778_v1  ;;  %v529_v15 = vrot.slane %v517_v8, %v528_v9 }
 0x643   :  { %v536_v19 = vrot.slane %v522_v12, %v528_v9 }
 0x644   :  { %v519_v13 = vpop.permute.xlu0 %518 }
 0x645   :  { %v537_v17 = vcombine.high %v519_v13, %v778_v1  ;;  %v544_v18 = vrot.slane %v519_v13, %v528_v9 }
 0x647   :  { %v551_v20 = vrot.slane %v537_v17, %v528_v9  ;;  %v552_v21 = vcombine.low %v529_v15, %v544_v18  ;;  %v553_v22 = vcombine.high %v529_v15, %v544_v18 }
 0x649   :  { %v560_v23 = vrot.slane %v552_v21, %v559_v16  ;;  %v568_v24 = vcombine.low %v536_v19, %v551_v20  ;;  %v569_v25 = vcombine.high %v536_v19, %v551_v20  ;;  %v567_v26 = vrot.slane %v553_v22, %v559_v16 }
 0x64b   :  { %593 = vrot.lane.b32.xlu0 %v567_v26, %s784_s6  ;;  %v583_v27 = vrot.slane %v569_v25, %v559_v16  ;;  %v584_v28 = vcombine.high %v560_v23, %v778_v1  ;;  %v576_v11 = vrot.slane %v568_v24, %v559_v16  ;;  %v585_v30 = vcombine.high %v567_v26, %v778_v1 }
 0x64d   :  { %605 = vrot.lane.b32.xlu1 %v583_v27, %s784_s6  ;;  %v587_v14 = vcombine.high %v583_v27, %v778_v1  ;;  %v586_v29 = vcombine.high %v576_v11, %v778_v1 }
 0x64f   :  { %589 = vrot.lane.b32.xlu0 %v584_v28, %s785_s7 }
 0x651   :  { %609 = vrot.lane.b32.xlu1 %v587_v14, %s786_s25 }
 0x653   :  { %601 = vrot.lane.b32.xlu0 %v586_v29, %s785_s7 }
 0x657   :  { %597 = vrot.lane.b32.xlu0 %v585_v30, %s786_s25 }
 0x6bd   :  { %v594_v31 = vpop.permute.xlu0 %593 }
 0x6bf   :  { %v606_v33 = vpop.permute.xlu1 %605 }
 0x6c1   :  { %v590_v32 = vpop.permute.xlu0 %589 }
 0x6c2   :  { %v612_v35 = vsel %vm152_vm1, %v560_v23, %v590_v32 }
 0x6c3   :  { %v610_v38 = vpop.permute.xlu1 %609  ;;  %v613_v39 = vsel %vm79_vm2, %v612_v35, %v594_v31 }
 0x6c5   :  { %v602_v34 = vpop.permute.xlu0 %601 }
 0x6c6   :  { %v616_v36 = vsel %vm152_vm1, %v576_v11, %v602_v34 }
 0x6c7   :  { %v617_v37 = vsel %vm79_vm2, %v616_v36, %v606_v33 }
 0x6c8   :  { %v618_v1 = vsel %vm614_vm7, %v617_v37, %v610_v38 }
 0x6c9   :  { %v598_v40 = vpop.permute.xlu0 %597 }
 0x6ca   :  { %v615_v41 = vsel %vm614_vm7, %v613_v39, %v598_v40 }
 0x6cb   :  { %v621_v42 = vcombine.low %v615_v41, %v618_v1 }
 0x6cd   :  { %663 = vst.sshfl [vmem:[#allocation2] sm:$0x33 pattern:$0x76325410] %v621_v42 }
 0x6ce   :  { %765 = shalt.err (!%p762_p4)
}
 0x6cf   :  { %s766_s9 = scalar_lea.hbm %s959_s8, 64 }
 0x6d0   :  { %p767_p5 = scmp.ne.s32.totalorder %s959_s8, %s766_s9  ;;  %p770_p6 = scmp.lt.u32.totalorder %s766_s9, %s959_s8 }
 0x6d2   :  { %p772_p7 = pnand %p770_p6, %p767_p5 }
 0x6d4   :  { %775 = shalt.err (!%p772_p7)
}
 0x6d5   :  { %640 = dma.vmem_to_hbm [thread:$0]  %s638_s27, 64, %s959_s8, [#allocation3]  }
 0x6d6   :  { %776 = dma.done.wait [#allocation3], 64  }
 0x6d7   :  { %777 = vsyncadd [#allocation3], 4294967232 }
 0x6d8   :  { %644 = vsyncpa [#allocation3], 1 }

</bundles_post_ra>
